<compile_context>
chip_gen: v5e
topology: v5e:2x2
jax: 0.10.0
libtpu: 0.0.40
codegen_flags: <defaults>
</compile_context>

<pallas_src>
import math

import jax
import jax.numpy as jnp
from jax.experimental import pallas as pl
from jax.experimental.pallas import tpu as pltpu

_LANES = 128
_MAX_BLOCK_ROWS = 1024  # 1024 x 128 x 4B = 512 KiB per buffer; safe on v5e/v6e/v7x


def _scale_kernel(param_ref, x_ref, o_ref):
    # param is a single f32 scalar in SMEM; body is one broadcast multiply.
    o_ref[...] = (x_ref[...] * param_ref[0]).astype(o_ref.dtype)


def _apply_scale(flat: jnp.ndarray, param: jnp.ndarray) -> jnp.ndarray:
    """Elementwise `flat * param` via a lane-dense Pallas kernel."""
    total = flat.shape[0]
    rows = -(-total // _LANES)                      # ceil-div

    if rows <= _MAX_BLOCK_ROWS:
        block_rows = rows                           # single full-extent block
        padded_rows = rows
    else:
        block_rows = _MAX_BLOCK_ROWS
        padded_rows = -(-rows // block_rows) * block_rows

    padded_total = padded_rows * _LANES
    if padded_total != total:
        flat = jnp.pad(flat, (0, padded_total - total))
    x2d = flat.reshape(padded_rows, _LANES)

    grid = (padded_rows // block_rows,)
    out2d = pl.pallas_call(
        _scale_kernel,
        out_shape=jax.ShapeDtypeStruct((padded_rows, _LANES), flat.dtype),
        grid=grid,
        in_specs=[
            pl.BlockSpec(memory_space=pltpu.SMEM),              # param scalar
            pl.BlockSpec((block_rows, _LANES), lambda i: (i, 0)),
        ],
        out_specs=pl.BlockSpec((block_rows, _LANES), lambda i: (i, 0)),
        compiler_params=pltpu.CompilerParams(
            dimension_semantics=("parallel",)),
    )(param, x2d)

    out = out2d.reshape(padded_total)
    if padded_total != total:
        out = out[:total]
    return out


class ParametricTransformPallas:
    """JAX/Pallas port of ParametricTransform (forward pass)."""

    def __init__(self, lower: float = 0.1, upper: float = 2.0,
                 mean: float = 0.05):
        # Clamp `mean` exactly as the PyTorch __init__ does.
        if mean <= 1e-06:
            mean = 1e-06
        elif mean >= 1 - 1e-06:
            mean = 1 - 1e-06
        # Deterministic parameter / buffer initialization (no checkpoint).
        self.lower = jnp.float32(lower)
        self.upper = jnp.float32(upper)
        self.mean_logit = jnp.float32(math.log(mean / (1.0 - mean)))

    def _param(self) -> jnp.ndarray:
        # magnitude_to_param(sigmoid(mean_logit)) — computed once in f32.
        magnitude = jax.nn.sigmoid(self.mean_logit)
        param = self.lower + (self.upper - self.lower) * magnitude
        return param.astype(jnp.float32).reshape(1)

    def __call__(self, img: jnp.ndarray) -> jnp.ndarray:
        if img.ndim not in (3, 4):
            raise ValueError(
                "Found invalid number of dimensions in input image(s)")
        # Same scalar param applies to every batch element (the PyTorch
        # `.repeat(N)` broadcast collapses to one scalar), so both the 3-D
        # and 4-D paths reduce to one lane-dense elementwise scale.
        param = self._param()
        out_flat = _apply_scale(img.reshape(-1), param)
        return out_flat.reshape(img.shape)


def _reference(module: ParametricTransformPallas, img: jnp.ndarray):
    """Pure-JAX reference for validation."""
    magnitude = jax.nn.sigmoid(module.mean_logit)
    param = module.lower + (module.upper - module.lower) * magnitude
    return img * param


if __name__ == "__main__":
    key = jax.random.PRNGKey(0)
    # Small shapes consistent with the module's forward (N, C, H, W).
    x4 = jax.random.normal(key, (2, 4, 16, 16), dtype=jnp.float32)
    x3 = x4[0]                                          # (C, H, W) path

    module = ParametricTransformPallas(lower=0.1, upper=2.0, mean=0.05)

    out4 = jax.block_until_ready(module(x4))
    out3 = jax.block_until_ready(module(x3))

    ref4 = _reference(module, x4)
    ref3 = _reference(module, x3)

    assert out4.shape == x4.shape and out4.dtype == x4.dtype
    assert out3.shape == x3.shape and out3.dtype == x3.dtype
    assert jnp.allclose(out4, ref4, atol=1e-5, rtol=1e-5)
    assert jnp.allclose(out3, ref3, atol=1e-5, rtol=1e-5)

    print("KERNEL_OK")
</pallas_src>

<mosaic_0001>
module attributes {stable_mosaic.version = 11 : i64} {
  func.func @_scale_kernel(%arg0: i32, %arg1: memref<1xf32, #tpu.memory_space<smem>>, %arg2: memref<16x128xf32, #tpu.memory_space<vmem>>, %arg3: memref<16x128xf32, #tpu.memory_space<vmem>>) attributes {dimension_semantics = [#tpu.dimension_semantics<parallel>], iteration_bounds = array<i64: 1>, scalar_prefetch = 0 : i64, scratch_operands = 0 : i64, tpu.core_type = #tpu.core_type<tc>, window_params = [{transform_indices = @transform_0, window_bounds = array<i64: 1>}, {transform_indices = @transform_1, window_bounds = array<i64: 16, 128>}, {transform_indices = @transform_2, window_bounds = array<i64: 16, 128>}]} {
    %c0 = arith.constant 0 : index
    %c0_0 = arith.constant 0 : index
    %0 = vector.load %arg2[%c0, %c0_0] : memref<16x128xf32, #tpu.memory_space<vmem>>, vector<16x128xf32>
    %c0_1 = arith.constant 0 : index
    %1 = memref.load %arg1[%c0_1] : memref<1xf32, #tpu.memory_space<smem>>
    %2 = vector.broadcast %1 : f32 to vector<16x128xf32>
    %3 = arith.mulf %0, %2 : vector<16x128xf32>
    %c0_2 = arith.constant 0 : index
    %c0_3 = arith.constant 0 : index
    %4 = vector.load %arg3[%c0_2, %c0_3] : memref<16x128xf32, #tpu.memory_space<vmem>>, vector<16x128xf32>
    tpu.vector_store %arg3[%c0_2, %c0_3], %3 {strides = array<i32>} : memref<16x128xf32, #tpu.memory_space<vmem>>, vector<16x128xf32>,
    return
  }
  func.func @transform_0(%arg0: i32) -> i32 {
    %c0_i32 = arith.constant 0 : i32
    %c0_i32_0 = arith.constant 0 : i32
    return %c0_i32 : i32
  }
  func.func @transform_1(%arg0: i32) -> (i32, i32) {
    %c0_i32 = arith.constant 0 : i32
    %c0_i32_0 = arith.constant 0 : i32
    return %arg0, %c0_i32 : i32, i32
  }
  func.func @transform_2(%arg0: i32) -> (i32, i32) {
    %c0_i32 = arith.constant 0 : i32
    %c0_i32_0 = arith.constant 0 : i32
    return %arg0, %c0_i32 : i32, i32
  }
}

</mosaic_0001>

<bundles_post_ra>
// kernel: tpu_custom_call.1
= control target key start
LH: loop header
LB: loop body
LE: loop exit
PB: predicated region body
PF: predicated region fallthrough
CT: control target
= control target key end

     0   :  { %8 = vsyncpa [#allocation4], 0  ;;  %s140_s0 = inlined_call_operand.<no memory space> [shape: f32[1], index: 0, kind: input, shape index: {}]   ;;  %s141_s1 = inlined_call_operand.hbm [shape: f32[16,128], index: 1, kind: input, shape index: {}]   ;;  %s142_s2 = inlined_call_operand.hbm [shape: f32[16,128], index: 2, kind: output, shape index: {}]  }
   0x1   :  { %9 = vsyncpa [#allocation5], 0  ;;  %s16_s11 = sshll.u32 %s141_s1, 4  ;;  %s112_s12 = smov [#allocation3]   ;;  %s17_s11 = int_to_ptr.hbm [resolvable:$true] %s16_s11 }
   0x2   :  { %s18_s13 = sshll.u32 %s112_s12, 4  ;;  %s113_s14 = smov 128   ;;  %s19_s13 = int_to_ptr.vmem [resolvable:$true] %s18_s13 }
   0x3   :  { %s114_s15 = smov 8  }
   0x4   :  { %24 = dma.hbm_to_vmem [thread:$0]  %s17_s11, 256, %s19_s13, [#allocation4], %s113_s14, %s113_s14, %s114_s15  }
   0x5   :  { %108 = dma.done.wait [#allocation4], 256  }
   0x6   :  { %109 = vsyncadd [#allocation4], 4294967040  ;;  %v32_v0 = vstv %s140_s0  ;;  %s115_s18 = smov [#allocation6]   ;;  %s43_s22 = sshll.u32 %s142_s2, 4  ;;  %v29_v1 = vld [vmem:[#allocation3] sm:$0xff]  ;;  %v30_v2 = vld [vmem:[#allocation3 + $0x8] sm:$0xff]  ;;  %s44_s22 = int_to_ptr.hbm [resolvable:$true] %s43_s22 }
   0x7   :  { %s41_s19 = sshll.u32 %s115_s18, 4  ;;  %v33_v3 = vmul.f32 %v32_v0, %v29_v1  ;;  %v34_v4 = vmul.f32 %v32_v0, %v30_v2  ;;  %s42_s19 = int_to_ptr.vmem [resolvable:$true] %s41_s19 }
   0x9   :  { %35 = vst [vmem:[#allocation6] sm:$0xff] %v33_v3 }
   0xa   :  { %36 = vst [vmem:[#allocation6 + $0x8] sm:$0xff] %v34_v4 }
   0xb   :  { %49 = dma.vmem_to_hbm [thread:$0]  %s42_s19, 256, %s44_s22, [#allocation5], %s113_s14, %s113_s14, %s114_s15  }
   0xc   :  { %110 = dma.done.wait [#allocation5], 256  }
   0xd   :  { %111 = vsyncadd [#allocation5], 4294967040 }
   0xe   :  { %54 = vsyncpa [#allocation4], 1 }
   0xf   :  { %55 = vsyncpa [#allocation5], 1 }

</bundles_post_ra>
